<compile_context>
chip_gen: v6e
topology: v6e:2x2x1
jax: 0.10.0
libtpu: 0.0.40
codegen_flags: <defaults>
</compile_context>

<pallas_src>
import jax
import jax.numpy as jnp
from jax import lax
from jax.experimental import pallas as pl
from jax.experimental.pallas import tpu as pltpu


def _gather_kernel(vs_ref, ids_smem, ids_ref, w_hbm, out_ref, gbuf, sem):
    """One token-block of the vocab-parallel embedding lookup (DMA row gather).

    vs_ref   : (1,)      int32 SMEM   global vocab-start of this partition
    ids_smem : (n_pad,)  int32 SMEM   all (padded) token ids, for DMA row indexing
    ids_ref  : (T, 1)    int32 VMEM   this block's token ids, for the range mask
    w_hbm    : (Vp, D)   HBM (ANY)    this partition's embedding table (never DMA'd whole)
    out_ref  : (T, D)    VMEM         gathered, range-masked embeddings
    gbuf     : (T, D)    VMEM scratch row-gather landing buffer
    sem      : DMA semaphore shared by the T row copies of this block
    """
    i = pl.program_id(0)
    t_block = out_ref.shape[0]
    vp = w_hbm.shape[0]
    vs = vs_ref[0]
    base = i * t_block

    # Issue one row DMA per token. Ids outside this partition's vocab range are
    # clamped to row 0; their output rows are zeroed by the mask below, so the
    # clamped copy is never observed.
    def _issue(t, carry):
        local = ids_smem[base + t] - vs
        in_range = jnp.logical_and(local >= 0, local < vp)
        row = jnp.where(in_range, local, 0)
        pltpu.make_async_copy(
            w_hbm.at[pl.ds(row, 1), :],
            gbuf.at[pl.ds(t, 1), :],
            sem,
        ).start()
        return carry

    lax.fori_loop(0, t_block, _issue, 0)

    # Wait for all T row copies. They all signal the same semaphore and have
    # identical sizes, so T same-sized waits consume exactly what was signaled.
    def _wait(t, carry):
        pltpu.make_async_copy(
            w_hbm.at[pl.ds(0, 1), :],
            gbuf.at[pl.ds(t, 1), :],
            sem,
        ).wait()
        return carry

    lax.fori_loop(0, t_block, _wait, 0)

    # Zero the rows whose ids belong to other partitions (pad ids = -1 too).
    ids_vec = ids_ref[...]                                     # (T, 1) int32
    mask = jnp.logical_and(ids_vec >= vs, ids_vec < vs + vp)   # (T, 1) bool
    out_ref[...] = jnp.where(mask, gbuf[...], 0).astype(out_ref.dtype)


def vocab_parallel_embedding(ids, weight, vocab_start, *, t_block=128):
    """Forward pass of VocabParallelEmbedding for this rank's shard.

    ids         : (B, S) int32, global vocab ids
    weight      : (Vp, D) this partition's slice of the embedding table (any float dtype)
    vocab_start : first global vocab id owned by this partition
    Returns (B, S, D); ids outside [vocab_start, vocab_start + Vp) give zero rows
    (the cross-rank all_reduce is the identity on a single device).

    t_block: tokens per grid step. Raise to 256-512 for large token counts; keep
    >= 2 token blocks so both v7x TensorCores get work. VMEM per step is only
    ~3 * t_block * D * itemsize (gather buffer + double-buffered output), so even
    D = 8192 bf16 at t_block = 256 fits the default scoped VMEM limit.
    """
    b, s = ids.shape
    vp, d = weight.shape
    n_tok = b * s

    # Pad the token count to a multiple of t_block; pad ids = -1 (never in range).
    n_pad = pl.cdiv(n_tok, t_block) * t_block
    ids_flat = ids.reshape(n_tok).astype(jnp.int32)
    ids_flat = jnp.pad(ids_flat, (0, n_pad - n_tok), constant_values=-1)
    ids_2d = ids_flat.reshape(n_pad, 1)

    vs = jnp.asarray([vocab_start], dtype=jnp.int32)

    out_flat = pl.pallas_call(
        _gather_kernel,
        out_shape=jax.ShapeDtypeStruct((n_pad, d), weight.dtype),
        grid_spec=pltpu.PrefetchScalarGridSpec(
            num_scalar_prefetch=2,                 # vocab_start, ids -> SMEM
            grid=(n_pad // t_block,),              # token blocks
            in_specs=[
                pl.BlockSpec((t_block, 1), lambda i, vs, ids: (i, 0)),  # ids (mask)
                pl.BlockSpec(memory_space=pl.ANY),                       # weight in HBM
            ],
            out_specs=pl.BlockSpec((t_block, d), lambda i, vs, ids: (i, 0)),
            scratch_shapes=[
                pltpu.VMEM((t_block, d), weight.dtype),   # row-gather landing buffer
                pltpu.SemaphoreType.DMA(()),              # shared by the row copies
            ],
        ),
        compiler_params=pltpu.CompilerParams(
            dimension_semantics=("parallel",)),
    )(vs, ids_flat, ids_2d, weight)

    return out_flat[:n_tok].reshape(b, s, d)


def _reference(ids, weight, vocab_start, vocab_end):
    oob = (ids < vocab_start) | (ids >= vocab_end)
    local = jnp.where(oob, 0, ids - vocab_start)
    out = weight[local]
    return jnp.where(oob[..., None], 0.0, out)


if __name__ == "__main__":
    num_embeddings = 512      # global vocab size
    embedding_dim = 128       # lane-dense output
    batch, seq = 2, 100       # n_tok = 200 -> padded to 256 (2 token blocks, tail masked)

    key = jax.random.PRNGKey(0)
    k_ids, k_w = jax.random.split(key, 2)
    ids = jax.random.randint(k_ids, (batch, seq), 0, num_embeddings, dtype=jnp.int32)

    std = (2.0 / (num_embeddings + embedding_dim)) ** 0.5      # xavier_normal_
    weight_full = jax.random.normal(
        k_w, (num_embeddings, embedding_dim), jnp.float32) * std

    # --- Check 1: world_size = 1 (this rank owns the whole vocab) ------------------
    out = jax.block_until_ready(vocab_parallel_embedding(ids, weight_full, 0))
    ref = _reference(ids, weight_full, 0, num_embeddings)
    assert out.shape == (batch, seq, embedding_dim)
    assert jnp.allclose(out, ref, atol=1e-6), "mismatch vs reference (world_size=1)"

    # --- Check 2: simulated world_size = 2 (split the table across two ranks) ------
    per_part = num_embeddings // 2
    w0 = weight_full[:per_part]
    w1 = weight_full[per_part:]

    out0 = jax.block_until_ready(vocab_parallel_embedding(ids, w0, 0))
    out1 = jax.block_until_ready(vocab_parallel_embedding(ids, w1, per_part))
    ref0 = _reference(ids, w0, 0, per_part)
    ref1 = _reference(ids, w1, per_part, num_embeddings)
    assert jnp.allclose(out0, ref0, atol=1e-6), "mismatch (world_size=2, rank=0)"
    assert jnp.allclose(out1, ref1, atol=1e-6), "mismatch (world_size=2, rank=1)"

    # Partial outputs sum (the all_reduce) to the full-table lookup.
    assert jnp.allclose(out0 + out1, ref, atol=1e-6), "partial sum != full lookup"

    print("KERNEL_OK")
</pallas_src>

<mosaic_0001>
module attributes {stable_mosaic.version = 11 : i64} {
  func.func @_gather_kernel(%arg0: i32, %arg1: memref<1xi32, #tpu.memory_space<smem>>, %arg2: memref<256xi32, #tpu.memory_space<smem>>, %arg3: memref<128x1xi32, #tpu.memory_space<vmem>>, %arg4: memref<512x128xf32, #tpu.memory_space<any>>, %arg5: memref<128x128xf32, #tpu.memory_space<vmem>>, %arg6: memref<128x128xf32, #tpu.memory_space<vmem>>, %arg7: memref<!tpu.dma_semaphore, #tpu.memory_space<semaphore_mem>>) attributes {dimension_semantics = [#tpu.dimension_semantics<parallel>], iteration_bounds = array<i64: 2>, scalar_prefetch = 2 : i64, scratch_operands = 2 : i64, tpu.core_type = #tpu.core_type<tc>, window_params = [{transform_indices = @transform_0, window_bounds = array<i64: 128, 1>}, {}, {transform_indices = @transform_2, window_bounds = array<i64: 128, 128>}]} {
    %c0 = arith.constant 0 : index
    %0 = memref.load %arg1[%c0] : memref<1xi32, #tpu.memory_space<smem>>
    %c128_i32 = arith.constant 128 : i32
    %1 = arith.muli %arg0, %c128_i32 : i32
    %c0_i32 = arith.constant 0 : i32
    %c128_i32_0 = arith.constant 128 : i32
    %2 = arith.addi %c0_i32, %c128_i32_0 : i32
    %c1_i32 = arith.constant 1 : i32
    scf.for %arg8 = %c0_i32 to %2 step %c1_i32  : i32 {
      %18 = arith.addi %1, %arg8 : i32
      %19 = arith.index_cast %18 : i32 to index
      %20 = memref.load %arg2[%19] : memref<256xi32, #tpu.memory_space<smem>>
      %21 = arith.subi %20, %0 : i32
      %c0_i32_13 = arith.constant 0 : i32
      %22 = arith.cmpi sge, %21, %c0_i32_13 : i32
      %c512_i32_14 = arith.constant 512 : i32
      %23 = arith.cmpi slt, %21, %c512_i32_14 : i32
      %24 = arith.andi %22, %23 : i1
      %c0_i32_15 = arith.constant 0 : i32
      %25 = arith.select %24, %21, %c0_i32_15 : i32
      %c0_i32_16 = arith.constant 0 : i32
      %26 = tpu.memref_slice %arg4[%25, %c0_i32_16] : memref<512x128xf32, #tpu.memory_space<any>> -> memref<1x128xf32, #tpu.memory_space<any>>
      %c0_i32_17 = arith.constant 0 : i32
      %27 = tpu.memref_slice %arg6[%arg8, %c0_i32_17] : memref<128x128xf32, #tpu.memory_space<vmem>> -> memref<1x128xf32, #tpu.memory_space<vmem>>
      tpu.enqueue_dma source(%26 : memref<1x128xf32, #tpu.memory_space<any>>) target(%27 : memref<1x128xf32, #tpu.memory_space<vmem>>) target_semaphore(%arg7 : memref<!tpu.dma_semaphore, #tpu.memory_space<semaphore_mem>>)
    }
    %c128_i32_1 = arith.constant 128 : i32
    %c0_i32_2 = arith.constant 0 : i32
    %c128_i32_3 = arith.constant 128 : i32
    %3 = arith.addi %c0_i32_2, %c128_i32_3 : i32
    %c1_i32_4 = arith.constant 1 : i32
    scf.for %arg8 = %c0_i32_2 to %3 step %c1_i32_4  : i32 {
      %c0_i32_13 = arith.constant 0 : i32
      %c0_i32_14 = arith.constant 0 : i32
      %18 = tpu.memref_slice %arg4[%c0_i32_13, %c0_i32_14] : memref<512x128xf32, #tpu.memory_space<any>> -> memref<1x128xf32, #tpu.memory_space<any>>
      %c0_i32_15 = arith.constant 0 : i32
      %19 = tpu.memref_slice %arg6[%arg8, %c0_i32_15] : memref<128x128xf32, #tpu.memory_space<vmem>> -> memref<1x128xf32, #tpu.memory_space<vmem>>
      tpu.wait_dma2 semaphore(%arg7 : memref<!tpu.dma_semaphore, #tpu.memory_space<semaphore_mem>>) src(%18 : memref<1x128xf32, #tpu.memory_space<any>>) dst(%19 : memref<1x128xf32, #tpu.memory_space<vmem>>)
    }
    %c128_i32_5 = arith.constant 128 : i32
    %c0_6 = arith.constant 0 : index
    %c0_7 = arith.constant 0 : index
    %4 = vector.load %arg3[%c0_6, %c0_7] : memref<128x1xi32, #tpu.memory_space<vmem>>, vector<128x1xi32>
    %5 = vector.broadcast %0 : i32 to vector<128x1xi32>
    %6 = arith.cmpi sge, %4, %5 : vector<128x1xi32>
    %c512_i32 = arith.constant 512 : i32
    %7 = arith.addi %0, %c512_i32 : i32
    %8 = vector.broadcast %7 : i32 to vector<128x1xi32>
    %9 = arith.cmpi slt, %4, %8 : vector<128x1xi32>
    %10 = arith.andi %6, %9 : vector<128x1xi1>
    %c0_8 = arith.constant 0 : index
    %c0_9 = arith.constant 0 : index
    %11 = vector.load %arg6[%c0_8, %c0_9] : memref<128x128xf32, #tpu.memory_space<vmem>>, vector<128x128xf32>
    %c0_i32_10 = arith.constant 0 : i32
    %12 = arith.sitofp %c0_i32_10 : i32 to f32
    %13 = vector.shape_cast %10 : vector<128x1xi1> to vector<128x1xi1>
    %14 = vector.broadcast %13 : vector<128x1xi1> to vector<128x128xi1>
    %15 = vector.broadcast %12 : f32 to vector<128x128xf32>
    %16 = arith.select %14, %11, %15 : vector<128x128xi1>, vector<128x128xf32>
    %c0_11 = arith.constant 0 : index
    %c0_12 = arith.constant 0 : index
    %17 = vector.load %arg5[%c0_11, %c0_12] : memref<128x128xf32, #tpu.memory_space<vmem>>, vector<128x128xf32>
    tpu.vector_store %arg5[%c0_11, %c0_12], %16 {strides = array<i32>} : memref<128x128xf32, #tpu.memory_space<vmem>>, vector<128x128xf32>,
    return
  }
  func.func @transform_0(%arg0: i32, %arg1: memref<1xi32, #tpu.memory_space<smem>>, %arg2: memref<256xi32, #tpu.memory_space<smem>>) -> (i32, i32) {
    %c0_i32 = arith.constant 0 : i32
    %c0_i32_0 = arith.constant 0 : i32
    return %arg0, %c0_i32 : i32, i32
  }
  func.func @transform_2(%arg0: i32, %arg1: memref<1xi32, #tpu.memory_space<smem>>, %arg2: memref<256xi32, #tpu.memory_space<smem>>) -> (i32, i32) {
    %c0_i32 = arith.constant 0 : i32
    %c0_i32_0 = arith.constant 0 : i32
    return %arg0, %c0_i32 : i32, i32
  }
}

</mosaic_0001>

<bundles_post_ra>
// kernel: tpu_custom_call.1
= control target key start
LH: loop header
LB: loop body
LE: loop exit
PB: predicated region body
PF: predicated region fallthrough
CT: control target
= control target key end

     0   :  { %s911_s0 = inlined_call_operand.<no memory space> [shape: s32[1], index: 0, kind: input, shape index: {}]   ;;  %s912_s1 = inlined_call_operand.vmem [shape: s32[256], index: 1, kind: input, shape index: {}]   ;;  %s913_s2 = inlined_call_operand.vmem [shape: s32[256,1], index: 2, kind: input, shape index: {}]   ;;  %s914_s3 = inlined_call_operand.hbm [shape: f32[512,128], index: 3, kind: input, shape index: {}]   ;;  %s915_s4 = inlined_call_operand.hbm [shape: f32[256,128], index: 4, kind: output, shape index: {}]  }
   0x1   :  { %9 = sst [smem:[#allocation5]] %s911_s0  ;;  %s10_s19 = sshll.u32 %s912_s1, 4  ;;  %s11_s19 = int_to_ptr.vmem [resolvable:$true] %s10_s19 }
   0x2   :  { %s535_s20 = scalar_lea.vmem %s11_s19, 32  ;;  %p540_p1 = scmp.lt.s32.totalorder %s11_s19, %s11_s19 }
   0x3   :  { %p536_p0 = scmp.ne.s32.totalorder %s11_s19, %s535_s20  ;;  %p541_p2 = scmp.lt.s32.totalorder %s535_s20, %s535_s20 }
   0x5   :  { %p542_p3 = por %p541_p2, %p540_p1 }
   0x7   :  { %p543_p4 = pnand %p542_p3, %p536_p0 }
   0x9   :  { %546 = shalt.err (!%p543_p4)  }
   0xa   :  { %s651_s21 = smov [#allocation6]  }
   0xb   :  { %13 = dma.vmem_to_smem %s11_s19, 32, %s651_s21, [#allocation4] }
   0xc   :  { %619 = dma.done.wait [#allocation4], 32 }
   0xd   :  { %620 = vsyncadd [#allocation4], 4294967264 }
   0xe   :  { %15 = sfence }
   0xf   :  { %16 = vsyncpa [#allocation8], 0 }
  0x10   :  { %18 = vsyncpa [#allocation8 + $0x1], 0  ;;  %s688_s0 = smov 0   ;;  %s690_s22 = smov 0  }
  0x11   :  { %s692_s1 = smov 0   ;;  %s694_s23 = smov 0  }
  0x12 LB: > { %s709_s24 = sadd.s32 4294967295, %s641_s23   ;;  %s457_s25 = sadd.s32 4294967294, %s641_s23   ;;  %s641_s23 = sphi %s694_s23, %s922_s23   ;;  %s637_s1 = sphi %s692_s1, %s921_s1   ;;  %s633_s22 = sphi %s690_s22, %s920_s22   ;;  %s629_s0 = sphi %s688_s0, %s919_s0  }
  0x13   : > { %s713_s26 = sadd.s32 1, %s641_s23   ;;  %s57_s27 = sadd.s32 1, %s637_s1 }
  0x14   : > { %s54_s28 = ssub.s32 %s641_s23, %s713_s26  ;;  %p67_p5 = scmp.ne.s32.totalorder %s637_s1, %s633_s22 }
  0x15   : > { %p55_p6 = scmp.eq.s32.totalorder %s54_s28, 0  ;;  %p68_p7 = scmp.eq.s32.totalorder %s709_s24, 1 }
  0x16   : > { %p73_p8 = scmp.ne.s32.totalorder %s633_s22, %s629_s0  ;;  %p74_p9 = scmp.eq.s32.totalorder %s457_s25, 1 }
  0x17   : > { %s724_s29 = scalar_select %p55_p6, %s637_s1, %s57_s27  }
  0x18   : > { %p726_p10 = por %p68_p7, %p67_p5  ;;  %p730_p11 = por %p74_p9, %p73_p8 }
  0x19   : > { %p460_p12 = scmp.ge.s32.totalorder %s641_s23, 1  ;;  %p101_p13 = scmp.lt.s32.totalorder %s641_s23, 3 }
  0x1b   : > { %p102_p0 = pnand %p460_p12, %p101_p13 }
  0x1c   : > { %s118_s6 = sand.u32 (!%p102_p0), 1, %s633_s22   ;;  %s462_s7 = sshll.u32 (!%p102_p0), %s709_s24, 4 }
  0x1d   : > { %105 = sbr.rel (%p102_p0) target bundleno = 257 (0x101), region = 24  ;;  %s461_s8 = sshll.u32 (!%p102_p0), %s118_s6, 7 }
  0x1e   : > { %p122_p1 = scmp.lt.s32.totalorder (!%p102_p0), %s462_s7, 31  ;;  %s740_s9 = sld [smem:[#allocation5]] (!%p102_p0) }
  0x1f   : > { %s748_s15 = scalar_lea.vmem (!%p102_p0), [#allocation7], %s461_s8  ;;  %s750_s16 = smov (!%p102_p0), 0  }
  0x22   : > { %s924_s7 = smov (!%p122_p1, %s462_s7), 31 }
  0x23   : > { %s463_s11 = sshll.u32 %s924_s7, 3 }
  0x24   : > { %s746_s14 = scalar_lea.vmem %s913_s2, %s463_s11 }
  0x25 LB: >> { %s918_s10 = sshll.u32 %s709_s24, 7  ;;  %s146_s20 = scalar_lea.vmem [#allocation2], %s645_s16  ;;  %s645_s16 = sphi %s750_s16, %s135_s16  }
  0x26   : >> { %s136_s17 = sadd.s32 %s645_s16, %s918_s10  ;;  %s154_s21 = sshll.u32 %s146_s20, 4  ;;  %s155_s21 = int_to_ptr.vmem [resolvable:$true] %s154_s21 }
  0x27   : >> { %s137_s18 = sld [smem:[#allocation6 + %s136_s17]]  ;;  %s549_s13 = scalar_lea.hbm %s914_s3, 8192 }
  0x2d   : >> { %s138_s19 = ssub.s32 %s137_s18, %s740_s9 }
  0x2e   : >> { %p139_p2 = scmp.ge.s32.totalorder %s138_s19, 0  ;;  %p140_p3 = scmp.lt.s32.totalorder %s138_s19, 512 }
  0x30   : >> { %p141_p4 = pnand %p140_p3, %p139_p2 }
  0x32   : >> { %s926_s19 = smov (%p141_p4, %s138_s19), 0 }
  0x33   : >> { %s466_s25 = sshll.u32 %s926_s19, 4 }
  0x34   : >> { %s145_s7 = scalar_lea.hbm %s914_s3, %s466_s25 }
  0x35   : >> { %s547_s8 = scalar_lea.hbm %s145_s7, 16  ;;  %p550_p6 = scmp.lt.s32.totalorder %s145_s7, %s914_s3 }
  0x36   : >> { %p548_p5 = scmp.ne.s32.totalorder %s145_s7, %s547_s8  ;;  %p551_p7 = scmp.lt.s32.totalorder %s549_s13, %s547_s8 }
  0x38   : >> { %p552_p8 = por %p551_p7, %p550_p6 }
  0x3a   : >> { %p553_p9 = pnand %p552_p8, %p548_p5 }
  0x3c   : >> { %556 = shalt.err (!%p553_p9)  }
  0x3d   : >> { %s557_s20 = scalar_lea.vmem %s155_s21, 16  ;;  %s652_s19 = smov [#allocation2]  }
  0x3e   : >> { %p558_p12 = scmp.ne.s32.totalorder %s155_s21, %s557_s20  ;;  %s559_s10 = sshll.u32 %s652_s19, 4  ;;  %s560_s10 = int_to_ptr.vmem [resolvable:$false] %s559_s10 }
  0x3f   : >> { %s561_s25 = scalar_lea.vmem %s560_s10, 2048  ;;  %p562_p13 = scmp.lt.s32.totalorder %s155_s21, %s560_s10 }
  0x40   : >> { %p563_p0 = scmp.lt.s32.totalorder %s561_s25, %s557_s20 }
  0x42   : >> { %p564_p1 = por %p563_p0, %p562_p13 }
  0x44   : >> { %p565_p2 = pnand %p564_p1, %p558_p12 }
  0x46   : >> { %568 = shalt.err (!%p565_p2)  }
  0x47   : >> { %157 = dma.hbm_to_vmem [thread:$0]  %s145_s7, 16, %s155_s21, [#allocation3] }
  0x48   : >> { %s135_s16 = sadd.s32 1, %s645_s16  }
  0x49   : >> { %p132_p3 = scmp.ge.s32.totalorder %s135_s16, 128  }
  0x4a   : > { %s647_s27 = smov (%p132_p3), 0  }
  0x4b   : > { %134 = sbr.rel (!%p132_p3) target bundleno = 37 (0x25), region = 79 }
  0x50 LB: >> { %621 = dma.done.wait [#allocation3], 16  ;;  %s649_s27 = sphi %s647_s27, %s163_s27  }
  0x51   : >> { %622 = vsyncadd [#allocation3], 4294967280  ;;  %s163_s27 = sadd.s32 1, %s649_s27  }
  0x52   : >> { %p160_p4 = scmp.ge.s32.totalorder %s163_s27, 128  }
  0x53   : > { %v169_v0 = vld [vmem:[%s746_s14 + $0x10] sm:$0xff] (%p160_p4)  ;;  %v774_v1 = vstv (%p160_p4), %s740_s9  ;;  %s200_s10 = sadd.s32 (%p160_p4), 512, %s740_s9  ;;  %v167_v2 = vld [vmem:[%s746_s14] sm:$0xff] (%p160_p4)  ;;  %v170_v3 = vld [vmem:[%s746_s14 + $0x18] sm:$0xff] (%p160_p4)  ;;  %v653_v4 = vmov (%p160_p4), 0   ;;  %s473_s9 = sshll.u32 (%p160_p4), %s709_s24, 11 }
  0x54   : > { %162 = sbr.rel (!%p160_p4) target bundleno = 80 (0x50), region = 90  ;;  %534 = vset.pattern.permute.xlu1 (%p160_p4), %v653_v4  ;;  %533 = vset.pattern.permute.xlu0 (%p160_p4), %v653_v4  ;;  %vm186_vm0 = vcmp.ge.s32.totalorder (%p160_p4), %v169_v0, %v774_v1  ;;  %v782_v5 = vstv (%p160_p4), %s200_s10  ;;  %vm184_vm1 = vcmp.ge.s32.totalorder (%p160_p4), %v167_v2, %v774_v1  ;;  %v168_v6 = vld [vmem:[%s746_s14 + $0x8] sm:$0xff] (%p160_p4)  ;;  %vm187_vm4 = vcmp.ge.s32.totalorder (%p160_p4), %v170_v3, %v774_v1  ;;  %v171_v8 = vld [vmem:[%s746_s14 + $0x20] sm:$0xff] (%p160_p4)  ;;  %v174_v11 = vld [vmem:[%s746_s14 + $0x38] sm:$0xff] (%p160_p4)  ;;  %s863_s28 = scalar_lea.hbm (%p160_p4), %s915_s4, %s473_s9 }
  0x55   : > { %v172_v7 = vld [vmem:[%s746_s14 + $0x28] sm:$0xff] (%p160_p4)  ;;  %vm204_vm2 = vcmp.lt.s32.totalorder (%p160_p4), %v169_v0, %v782_v5  ;;  %vm202_vm3 = vcmp.lt.s32.totalorder (%p160_p4), %v167_v2, %v782_v5  ;;  %vm205_vm5 = vcmp.lt.s32.totalorder (%p160_p4), %v170_v3, %v782_v5  ;;  %vm185_vm7 = vcmp.ge.s32.totalorder (%p160_p4), %v168_v6, %v774_v1  ;;  %v173_v13 = vld [vmem:[%s746_s14 + $0x30] sm:$0xff] (%p160_p4)  ;;  %v175_v17 = vld [vmem:[%s746_s14 + $0x40] sm:$0xff] (%p160_p4)  ;;  %s871_s24 = scalar_lea.sflag (%p160_p4), [#allocation8], %s118_s6  ;;  %s654_s8 = smov (%p160_p4), [#allocation7]  }
  0x56   : > { %vm220_vm6 = vmand (%p160_p4), %vm186_vm0, %vm204_vm2  ;;  %vm203_vm8 = vcmp.lt.s32.totalorder (%p160_p4), %v168_v6, %v782_v5  ;;  %vm189_vm10 = vcmp.ge.s32.totalorder (%p160_p4), %v172_v7, %v774_v1  ;;  %vm207_vm11 = vcmp.lt.s32.totalorder (%p160_p4), %v172_v7, %v782_v5  ;;  %vm188_vm13 = vcmp.ge.s32.totalorder (%p160_p4), %v171_v8, %v774_v1  ;;  %v176_v15 = vld [vmem:[%s746_s14 + $0x48] sm:$0xff] (%p160_p4)  ;;  %v178_v19 = vld [vmem:[%s746_s14 + $0x58] sm:$0xff] (%p160_p4)  ;;  %s573_s11 = sshll.u32 (%p160_p4), %s654_s8, 4  ;;  %s574_s11 = int_to_ptr.vmem [resolvable:$false] %s573_s11 }
  0x57   : > { %v252_v9 = vsel (%p160_p4), %vm220_vm6, 1, %v653_v4  ;;  %vm218_vm9 = vmand (%p160_p4), %vm184_vm1, %vm202_vm3  ;;  %vm206_vm14 = vcmp.lt.s32.totalorder (%p160_p4), %v171_v8, %v782_v5  ;;  %vm191_vm2 = vcmp.ge.s32.totalorder (%p160_p4), %v174_v11, %v774_v1  ;;  %vm209_vm3 = vcmp.lt.s32.totalorder (%p160_p4), %v174_v11, %v782_v5  ;;  %v177_v21 = vld [vmem:[%s746_s14 + $0x50] sm:$0xff] (%p160_p4)  ;;  %v180_v23 = vld [vmem:[%s746_s14 + $0x68] sm:$0xff] (%p160_p4)  ;;  %s575_s12 = scalar_lea.vmem (%p160_p4), %s574_s11, 4096 }
  0x58   : > { %273 = vperm.xlu1 (%p160_p4), %534, %v252_v9   ;;  %v250_v10 = vsel (%p160_p4), %vm218_vm9, 1, %v653_v4  ;;  %vm221_vm12 = vmand (%p160_p4), %vm187_vm4, %vm205_vm5  ;;  %vm190_vm4 = vcmp.ge.s32.totalorder (%p160_p4), %v173_v13, %v774_v1  ;;  %vm208_vm5 = vcmp.lt.s32.totalorder (%p160_p4), %v173_v13, %v782_v5  ;;  %vm211_vm9 = vcmp.lt.s32.totalorder (%p160_p4), %v176_v15, %v782_v5  ;;  %v179_v25 = vld [vmem:[%s746_s14 + $0x60] sm:$0xff] (%p160_p4)  ;;  %v182_v27 = vld [vmem:[%s746_s14 + $0x78] sm:$0xff] (%p160_p4) }
  0x59   : > { %267 = vperm.xlu0 %533, %v250_v10   ;;  %v253_v12 = vsel %vm221_vm12, 1, %v653_v4  ;;  %vm219_vm15 = vmand %vm185_vm7, %vm203_vm8  ;;  %vm193_vm8 = vcmp.ge.s32.totalorder %v176_v15, %v774_v1  ;;  %v181_v29 = vld [vmem:[%s746_s14 + $0x70] sm:$0xff]  ;;  %v234_v37 = vld [vmem:[#allocation2] sm:$0xff]  ;;  %s376_s14 = sshll.u32 %s748_s15, 4  ;;  %s865_s14 = int_to_ptr.vmem [resolvable:$true] %s376_s14 }
  0x5a   : > { %v251_v14 = vsel %vm219_vm15, 1, %v653_v4  ;;  %vm223_vm0 = vmand %vm189_vm10, %vm207_vm11  ;;  %vm192_vm10 = vcmp.ge.s32.totalorder %v175_v17, %v774_v1  ;;  %vm210_vm11 = vcmp.lt.s32.totalorder %v175_v17, %v782_v5  ;;  %vm213_vm15 = vcmp.lt.s32.totalorder %v178_v19, %v782_v5  ;;  %v236_v35 = vld [vmem:[#allocation2 + $0x10] sm:$0xff]  ;;  %v237_v41 = vld [vmem:[#allocation2 + $0x18] sm:$0xff]  ;;  %s569_s7 = scalar_lea.vmem %s865_s14, 2048  ;;  %p576_p8 = scmp.lt.s32.totalorder %s865_s14, %s574_s11 }
  0x5b   : > { %vm222_vm1 = vmand %vm188_vm13, %vm206_vm14  ;;  %v255_v16 = vsel %vm223_vm0, 1, %v653_v4  ;;  %vm195_vm14 = vcmp.ge.s32.totalorder %v178_v19, %v774_v1  ;;  %vm194_vm0 = vcmp.ge.s32.totalorder %v177_v21, %v774_v1  ;;  %v235_v43 = vld [vmem:[#allocation2 + $0x8] sm:$0xff]  ;;  %v238_v49 = vld [vmem:[#allocation2 + $0x20] sm:$0xff]  ;;  %p570_p5 = scmp.ne.s32.totalorder %s865_s14, %s569_s7  ;;  %p577_p9 = scmp.lt.s32.totalorder %s575_s12, %s569_s7 }
  0x5c   : > { %276 = vperm.xlu1 %534, %v253_v12   ;;  %v254_v18 = vsel %vm222_vm1, 1, %v653_v4  ;;  %vm225_vm6 = vmand %vm191_vm2, %vm209_vm3  ;;  %vm212_vm1 = vcmp.lt.s32.totalorder %v177_v21, %v782_v5  ;;  %v239_v47 = vld [vmem:[#allocation2 + $0x28] sm:$0xff]  ;;  %v241_v53 = vld [vmem:[#allocation2 + $0x38] sm:$0xff] }
  0x5d   : > { %270 = vperm.xlu0 %533, %v251_v14   ;;  %vm224_vm7 = vmand %vm190_vm4, %vm208_vm5  ;;  %v257_v20 = vsel %vm225_vm6, 1, %v653_v4  ;;  %vm197_vm4 = vcmp.ge.s32.totalorder %v180_v23, %v774_v1  ;;  %vm215_vm5 = vcmp.lt.s32.totalorder %v180_v23, %v782_v5  ;;  %vm196_vm6 = vcmp.ge.s32.totalorder %v179_v25, %v774_v1  ;;  %v240_v55 = vld [vmem:[#allocation2 + $0x30] sm:$0xff]  ;;  %v243_v59 = vld [vmem:[#allocation2 + $0x48] sm:$0xff]  ;;  %p571_p6 = pnand %p570_p5, %p726_p10  ;;  %p578_p12 = por %p577_p9, %p576_p8 }
  0x5e   : > { %v256_v22 = vsel %vm224_vm7, 1, %v653_v4  ;;  %vm227_vm12 = vmand %vm193_vm8, %vm211_vm9  ;;  %vm214_vm7 = vcmp.lt.s32.totalorder %v179_v25, %v782_v5  ;;  %v242_v61 = vld [vmem:[#allocation2 + $0x40] sm:$0xff]  ;;  %v244_v3 = vld [vmem:[#allocation2 + $0x50] sm:$0xff] }
  0x5f   : > { %vm226_vm13 = vmand %vm192_vm10, %vm210_vm11  ;;  %v259_v24 = vsel %vm227_vm12, 1, %v653_v4  ;;  %vm199_vm10 = vcmp.ge.s32.totalorder %v182_v27, %v774_v1  ;;  %vm217_vm11 = vcmp.lt.s32.totalorder %v182_v27, %v782_v5  ;;  %vm198_vm12 = vcmp.ge.s32.totalorder %v181_v29, %v774_v1  ;;  %v245_v1 = vld [vmem:[#allocation2 + $0x58] sm:$0xff]  ;;  %v247_v7 = vld [vmem:[#allocation2 + $0x68] sm:$0xff]  ;;  %p572_p7 = pneg %p571_p6 }
  0x60   : > { %282 = vperm.xlu1 %534, %v255_v16   ;;  %v258_v26 = vsel %vm226_vm13, 1, %v653_v4  ;;  %vm229_vm2 = vmand %vm195_vm14, %vm213_vm15  ;;  %vm216_vm13 = vcmp.lt.s32.totalorder %v181_v29, %v782_v5  ;;  %v246_v9 = vld [vmem:[#allocation2 + $0x60] sm:$0xff]  ;;  %v249_v13 = vld [vmem:[#allocation2 + $0x78] sm:$0xff] }
  0x61   : > { %279 = vperm.xlu0 %533, %v254_v18   ;;  %vm228_vm3 = vmand %vm194_vm0, %vm212_vm1  ;;  %v261_v28 = vsel %vm229_vm2, 1, %v653_v4  ;;  %v248_v15 = vld [vmem:[#allocation2 + $0x70] sm:$0xff]  ;;  %p579_p13 = pnand %p578_p12, %p572_p7 }
  0x62   : > { %v260_v30 = vsel %vm228_vm3, 1, %v653_v4  ;;  %vm231_vm8 = vmand %vm197_vm4, %vm215_vm5 }
  0x63   : > { %vm230_vm9 = vmand %vm196_vm6, %vm214_vm7  ;;  %v263_v31 = vsel %vm231_vm8, 1, %v653_v4 }
  0x64   : > { %288 = vperm.xlu1 %534, %v257_v20   ;;  %v262_v32 = vsel %vm230_vm9, 1, %v653_v4  ;;  %vm233_vm14 = vmand %vm199_vm10, %vm217_vm11 }
  0x65   : > { %285 = vperm.xlu0 %533, %v256_v22   ;;  %vm232_vm15 = vmand %vm198_vm12, %vm216_vm13  ;;  %v265_v33 = vsel %vm233_vm14, 1, %v653_v4 }
  0x66   : > { %v264_v34 = vsel %vm232_vm15, 1, %v653_v4 }
  0x68   : > { %294 = vperm.xlu1 %534, %v259_v24  }
  0x69   : > { %291 = vperm.xlu0 %533, %v258_v26  }
  0x6c   : > { %300 = vperm.xlu1 %534, %v261_v28  }
  0x6d   : > { %297 = vperm.xlu0 %533, %v260_v30  }
  0x70   : > { %306 = vperm.xlu1 %534, %v263_v31  }
  0x71   : > { %303 = vperm.xlu0 %533, %v262_v32  }
  0x74   : > { %312 = vperm.xlu1 %534, %v265_v33  }
  0x75   : > { %309 = vperm.xlu0 %533, %v264_v34  }
  0xd3   : > { %v274_v36 = vpop.permute.xlu1 %273 }
  0xd4   : > { %vm316_vm0 = vcmp.eq.s32.totalorder %v274_v36, 1  ;;  %v268_v38 = vpop.permute.xlu0 %267 }
  0xd5   : > { %v332_v39 = vsel %vm316_vm0, %v236_v35, 0.0  ;;  %vm314_vm1 = vcmp.eq.s32.totalorder %v268_v38, 1 }
  0xd6   : > { %348 = vst [vmem:[%s748_s15 + $0x10] sm:$0xff] %v332_v39  ;;  %v330_v40 = vsel %vm314_vm1, %v234_v37, 0.0 }
  0xd7   : > { %346 = vst [vmem:[%s748_s15] sm:$0xff] %v330_v40  ;;  %v277_v42 = vpop.permute.xlu1 %276 }
  0xd8   : > { %vm317_vm2 = vcmp.eq.s32.totalorder %v277_v42, 1  ;;  %v271_v44 = vpop.permute.xlu0 %270 }
  0xd9   : > { %v333_v45 = vsel %vm317_vm2, %v237_v41, 0.0  ;;  %vm315_vm3 = vcmp.eq.s32.totalorder %v271_v44, 1 }
  0xda   : > { %349 = vst [vmem:[%s748_s15 + $0x18] sm:$0xff] %v333_v45  ;;  %v331_v46 = vsel %vm315_vm3, %v235_v43, 0.0 }
  0xdb   : > { %347 = vst [vmem:[%s748_s15 + $0x8] sm:$0xff] %v331_v46  ;;  %v283_v48 = vpop.permute.xlu1 %282 }
  0xdc   : > { %vm319_vm4 = vcmp.eq.s32.totalorder %v283_v48, 1  ;;  %v280_v50 = vpop.permute.xlu0 %279 }
  0xdd   : > { %v335_v51 = vsel %vm319_vm4, %v239_v47, 0.0  ;;  %vm318_vm5 = vcmp.eq.s32.totalorder %v280_v50, 1 }
  0xde   : > { %351 = vst [vmem:[%s748_s15 + $0x28] sm:$0xff] %v335_v51  ;;  %v334_v52 = vsel %vm318_vm5, %v238_v49, 0.0 }
  0xdf   : > { %350 = vst [vmem:[%s748_s15 + $0x20] sm:$0xff] %v334_v52  ;;  %v289_v54 = vpop.permute.xlu1 %288 }
  0xe0   : > { %vm321_vm6 = vcmp.eq.s32.totalorder %v289_v54, 1  ;;  %v286_v56 = vpop.permute.xlu0 %285 }
  0xe1   : > { %v337_v57 = vsel %vm321_vm6, %v241_v53, 0.0  ;;  %vm320_vm7 = vcmp.eq.s32.totalorder %v286_v56, 1 }
  0xe2   : > { %353 = vst [vmem:[%s748_s15 + $0x38] sm:$0xff] %v337_v57  ;;  %v336_v58 = vsel %vm320_vm7, %v240_v55, 0.0 }
  0xe3   : > { %352 = vst [vmem:[%s748_s15 + $0x30] sm:$0xff] %v336_v58  ;;  %v295_v60 = vpop.permute.xlu1 %294 }
  0xe4   : > { %vm323_vm8 = vcmp.eq.s32.totalorder %v295_v60, 1  ;;  %v292_v62 = vpop.permute.xlu0 %291 }
  0xe5   : > { %v339_v63 = vsel %vm323_vm8, %v243_v59, 0.0  ;;  %vm322_vm9 = vcmp.eq.s32.totalorder %v292_v62, 1 }
  0xe6   : > { %355 = vst [vmem:[%s748_s15 + $0x48] sm:$0xff] %v339_v63  ;;  %v338_v0 = vsel %vm322_vm9, %v242_v61, 0.0 }
  0xe7   : > { %354 = vst [vmem:[%s748_s15 + $0x40] sm:$0xff] %v338_v0  ;;  %v301_v2 = vpop.permute.xlu1 %300 }
  0xe8   : > { %vm325_vm10 = vcmp.eq.s32.totalorder %v301_v2, 1  ;;  %v298_v4 = vpop.permute.xlu0 %297 }
  0xe9   : > { %v341_v5 = vsel %vm325_vm10, %v245_v1, 0.0  ;;  %vm324_vm11 = vcmp.eq.s32.totalorder %v298_v4, 1 }
  0xea   : > { %357 = vst [vmem:[%s748_s15 + $0x58] sm:$0xff] %v341_v5  ;;  %v340_v6 = vsel %vm324_vm11, %v244_v3, 0.0 }
  0xeb   : > { %356 = vst [vmem:[%s748_s15 + $0x50] sm:$0xff] %v340_v6  ;;  %v307_v8 = vpop.permute.xlu1 %306 }
  0xec   : > { %vm327_vm12 = vcmp.eq.s32.totalorder %v307_v8, 1  ;;  %v304_v10 = vpop.permute.xlu0 %303 }
  0xed   : > { %v343_v11 = vsel %vm327_vm12, %v247_v7, 0.0  ;;  %vm326_vm13 = vcmp.eq.s32.totalorder %v304_v10, 1 }
  0xee   : > { %359 = vst [vmem:[%s748_s15 + $0x68] sm:$0xff] %v343_v11  ;;  %v342_v12 = vsel %vm326_vm13, %v246_v9, 0.0 }
  0xef   : > { %358 = vst [vmem:[%s748_s15 + $0x60] sm:$0xff] %v342_v12  ;;  %v313_v14 = vpop.permute.xlu1 %312 }
  0xf0   : > { %vm329_vm14 = vcmp.eq.s32.totalorder %v313_v14, 1  ;;  %v310_v16 = vpop.permute.xlu0 %309 }
  0xf1   : > { %v345_v17 = vsel %vm329_vm14, %v249_v13, 0.0  ;;  %vm328_vm15 = vcmp.eq.s32.totalorder %v310_v16, 1 }
  0xf2   : > { %361 = vst [vmem:[%s748_s15 + $0x78] sm:$0xff] %v345_v17  ;;  %v344_v18 = vsel %vm328_vm15, %v248_v15, 0.0 }
  0xf3   : > { %360 = vst [vmem:[%s748_s15 + $0x70] sm:$0xff] %v344_v18 }
  0xf4   : > { %582 = shalt.err (!%p579_p13)
}
  0xf5   : > { %s583_s6 = scalar_lea.hbm %s863_s28, 2048  ;;  %s587_s17 = scalar_lea.hbm %s915_s4, 4096 }
  0xf6   : > { %p584_p0 = scmp.ne.s32.totalorder %s863_s28, %s583_s6  ;;  %p588_p3 = scmp.lt.s32.totalorder %s863_s28, %s915_s4 }
  0xf7   : > { %p589_p4 = scmp.lt.s32.totalorder %s587_s17, %s583_s6 }
  0xf8   : > { %p585_p1 = pnand %p584_p0, %p726_p10 }
  0xf9   : > { %p590_p5 = por %p589_p4, %p588_p3 }
  0xfa   : > { %p586_p2 = pneg %p585_p1 }
  0xfc   : > { %p591_p6 = pnand %p590_p5, %p586_p2 }
  0xfe   : > { %594 = shalt.err (!%p591_p6)
}
  0xff   : > { %s655_s19 = smov 128   ;;  %s656_s25 = smov 8  }
 0x100   : > { %474 = dma.vmem_to_hbm [thread:$0]  (%p726_p10), %s865_s14, 2048, %s863_s28, %s871_s24, %s655_s19, %s655_s19, %s656_s25  }
 0x101 PF: > { %p480_p7 = scmp.ge.s32.totalorder %s641_s23, 2  ;;  %s391_s27 = sand.u32 1, %s629_s0  }
 0x102   : > { %s392_s10 = scalar_lea.sflag [#allocation8], %s391_s27 }
 0x103   : > { %p477_p8 = pnand %p480_p7, %p730_p11 }
 0x105   : > { %p478_p9 = pneg %p477_p8 }
 0x107   : > { %624 = dma.done.wait (%p478_p9), %s392_s10, 2048  }
 0x108   : > { %626 = vsyncadd (%p478_p9), %s392_s10, 4294965248  ;;  %p21_p12 = scmp.ge.s32.totalorder %s713_s26, 4   ;;  %s919_s0 = smov %s633_s22 }
 0x109   : > { %s920_s22 = smov %s637_s1  ;;  %s921_s1 = smov %s724_s29 }
 0x10a   : > { %s922_s23 = smov %s713_s26  ;;  %23 = sbr.rel (!%p21_p12) target bundleno = 18 (0x12), region = 101 }
 0x10f   :  { %397 = vsyncpa [#allocation8], 1 }
 0x110   :  { %399 = vsyncpa [#allocation8 + $0x1], 1 }
 0x111   :  { %400 = vsyncmov [#allocation3] }
 0x114   :  { %s401_s23 = vpop.sfrf %400 }
 0x115   :  { %p472_p10 = scmp.ne.s32.totalorder %s401_s23, 0 }
 0x117   :  { %405 = shalt.err (%p472_p10)  }

</bundles_post_ra>
